<compile_context>
chip_gen: v7x
topology: tpu7x:2x2x1
jax: 0.10.0
libtpu: 0.0.40
codegen_flags: <defaults>
</compile_context>

<pallas_src>
import jax
import jax.numpy as jnp
from jax.experimental import pallas as pl
from jax.experimental.pallas import tpu as pltpu

# GRPOLoss.__init__ defaults
CLIP_EPS = 0.2
KL_WEIGHT = 0.1
ENTROPY_WEIGHT = 0.01
VALUE_WEIGHT = 0.5

# partial-sum lane layout (lanes 0..7 of the (B, 128) output)
# mask, pl*m, kl*m, ent*m, kl, ratio, adv, (v-r)^2
_N_PARTIALS = 8

_TB_CAP = 64      # keeps 8 running sums (<= 64 vregs) mostly resident
_TT_CAP = 2048    # per-step DMA large enough to hide the fixed grid overhead


def _round_up(x, m):
    return ((x + m - 1) // m) * m


def _divisor_tile(n, unit, cap, min_blocks=1):
    """Largest multiple-of-`unit` divisor of n that is <= cap, preferring one
    that yields at least `min_blocks` grid blocks.  Requires n % unit == 0."""
    cands = [d for d in range(unit, min(cap, n) + 1, unit) if n % d == 0]
    ok = [d for d in cands if n // d >= min_blocks]
    return max(ok) if ok else max(cands)


def _make_grpo_kernel(TB, TT, clip_eps):
    """Build the tiled GRPO kernel (hyper-params & tile geometry baked in)."""
    n_chunks = TT // 128

    def kernel(lp_ref, olp_ref, lref_ref, mask_ref, adv_ref, ret_ref, val_ref,
               ent_ref, out_ref,
               mask_acc, plm_acc, klm_acc, entm_acc, kl_acc, ratio_acc,
               adv_acc, mse_acc):
        j = pl.program_id(1)
        accs = (mask_acc, plm_acc, klm_acc, entm_acc,
                kl_acc, ratio_acc, adv_acc, mse_acc)

        @pl.when(j == 0)
        def _init():
            for acc in accs:
                acc[...] = jnp.zeros_like(acc)

        # Walk the (TB, TT) tile in 128-lane chunks; keep 8 running sums in
        # vregs and touch the (TB, 128) VMEM accumulators once per grid step.
        zero = jnp.zeros((TB, 128), jnp.float32)
        sums = [zero] * _N_PARTIALS

        for c in range(n_chunks):
            sl = slice(c * 128, (c + 1) * 128)      # static, vreg-granular
            lp = lp_ref[:, sl].astype(jnp.float32)
            olp = olp_ref[:, sl].astype(jnp.float32)
            lpr = lref_ref[:, sl].astype(jnp.float32)
            m = mask_ref[:, sl].astype(jnp.float32)
            adv = adv_ref[:, sl].astype(jnp.float32)
            ret = ret_ref[:, sl].astype(jnp.float32)
            val = val_ref[:, sl].astype(jnp.float32)
            ent = ent_ref[:, sl].astype(jnp.float32)

            # k3 KL estimator, mask applied to the log-ratio (as in reference)
            log_ratio = (lpr - lp) * m
            kl = jnp.exp(log_ratio) - log_ratio - 1.0

            # clipped PPO surrogate
            ratio = jnp.exp(lp - olp)
            surr1 = ratio * adv
            surr2 = jnp.clip(ratio, 1.0 - clip_eps, 1.0 + clip_eps) * adv
            policy_loss = -jnp.minimum(surr1, surr2)

            diff = val - ret

            sums[0] = sums[0] + m
            sums[1] = sums[1] + policy_loss * m
            sums[2] = sums[2] + kl * m
            sums[3] = sums[3] + ent * m
            sums[4] = sums[4] + kl
            sums[5] = sums[5] + ratio        # padded cols fixed in epilogue
            sums[6] = sums[6] + adv
            sums[7] = sums[7] + diff * diff

        for acc, s in zip(accs, sums):
            acc[...] += s

        @pl.when(j == pl.num_programs(1) - 1)
        def _finalize():
            # one cross-lane reduction per batch block, packed lane-dense
            lane = jax.lax.broadcasted_iota(jnp.int32, (TB, 128), 1)
            packed = jnp.zeros((TB, 128), jnp.float32)
            for k, acc in enumerate(accs):
                s = jnp.sum(acc[...], axis=-1, keepdims=True)  # (TB, 1)
                packed = jnp.where(lane == k, s, packed)
            out_ref[...] = packed

    return kernel


@jax.jit
def grpo_loss(log_probs, old_log_probs, log_probs_ref, action_mask,
              advantages, returns, values, entropy):
    """Returns (total_loss, metrics) matching GRPOLoss.forward (with entropy
    and values provided).  Inputs may be f32 or bf16 ([B, T] each); the kernel
    upcasts on load and accumulates in f32."""
    B, T = log_probs.shape

    # --- tile geometry: prefer exact divisors so no host-side padding pass ---
    if B % 8 == 0:
        TB = _divisor_tile(B, 8, _TB_CAP, min_blocks=2)   # >=2 blocks for v7x
        Bp = B
    else:
        TB = min(_TB_CAP, _round_up(B, 8))
        Bp = _round_up(B, TB)
        while Bp // TB < 2 and TB > 8:
            TB = _round_up(max(8, TB // 2), 8)
            Bp = _round_up(B, TB)

    if T % 128 == 0:
        TT = _divisor_tile(T, 128, _TT_CAP, min_blocks=1)
        Tp = T
    else:
        TT = min(_TT_CAP, _round_up(T, 128))
        Tp = _round_up(T, TT)

    def pad(x):
        if (Bp, Tp) == (B, T):
            return x
        return jnp.pad(x, ((0, Bp - B), (0, Tp - T)))

    inputs = [pad(x) for x in (log_probs, old_log_probs, log_probs_ref,
                               action_mask, advantages, returns, values,
                               entropy)]

    kernel = _make_grpo_kernel(TB, TT, CLIP_EPS)

    # advisory cost for the XLA scheduler (mem-bound custom call)
    bytes_accessed = int(sum(x.size * x.dtype.itemsize for x in inputs)
                         + Bp * 128 * 4)
    cost = pl.CostEstimate(flops=20 * Bp * Tp,
                           transcendentals=2 * Bp * Tp,
                           bytes_accessed=bytes_accessed)

    # 8 inputs x 2 pipeline buffers + 8 (TB,128) accumulators + output, with
    # headroom for compute temporaries / spills.  v5e default scoped VMEM is
    # 16 MiB, so raise it explicitly (physical: 128/128/64 MiB).
    tile_bytes = sum(2 * TB * TT * x.dtype.itemsize for x in inputs)
    tile_bytes += (_N_PARTIALS + 2) * TB * 128 * 4
    vmem_limit = int(min(48 << 20, max(24 << 20, 2 * tile_bytes)))

    partials = pl.pallas_call(
        kernel,
        out_shape=jax.ShapeDtypeStruct((Bp, 128), jnp.float32),
        grid_spec=pltpu.PrefetchScalarGridSpec(
            num_scalar_prefetch=0,
            grid=(Bp // TB, Tp // TT),
            in_specs=[pl.BlockSpec((TB, TT), lambda i, j: (i, j))] * 8,
            out_specs=pl.BlockSpec((TB, 128), lambda i, j: (i, 0)),
            scratch_shapes=[pltpu.VMEM((TB, 128), jnp.float32)] * _N_PARTIALS,
        ),
        compiler_params=pltpu.CompilerParams(
            dimension_semantics=("parallel", "arbitrary"),
            vmem_limit_bytes=vmem_limit),
        cost_estimate=cost,
    )(*inputs)

    # --- tiny final combine (B x 8 scalars) in plain JAX ---
    p = partials[:B, :_N_PARTIALS]
    mask_sum = jnp.maximum(p[:, 0], 1.0)

    pol_rows = p[:, 1] / mask_sum
    main_rows = (p[:, 1] + KL_WEIGHT * p[:, 2]) / mask_sum
    ent_rows = p[:, 3] / mask_sum

    inv_n = 1.0 / (B * T)
    ratio_total = jnp.sum(p[:, 5])
    if Tp != T:
        # every real row accumulated (Tp - T) extra exp(0) = 1 terms from the
        # zero-padded seq columns (padded rows were already sliced off above)
        ratio_total = ratio_total - float(B * (Tp - T))

    policy_loss = jnp.mean(pol_rows)
    entropy_loss = -ENTROPY_WEIGHT * jnp.mean(ent_rows)
    value_loss = jnp.sum(p[:, 7]) * inv_n          # F.mse_loss (mean)
    kl_mean = jnp.sum(p[:, 4]) * inv_n
    ratio_mean = ratio_total * inv_n
    adv_mean = jnp.sum(p[:, 6]) * inv_n

    total = jnp.mean(main_rows) + entropy_loss + VALUE_WEIGHT * value_loss

    metrics = {
        "policy_loss": policy_loss,
        "kl_divergence": kl_mean,
        "ratio_mean": ratio_mean,
        "advantages_mean": adv_mean,
        "entropy_loss": entropy_loss,
        "value_loss": value_loss,
    }
    return total, metrics


def _reference(log_probs, old_log_probs, log_probs_ref, action_mask,
               advantages, returns, values, entropy):
    """Pure-JAX (f32) port of the PyTorch forward, for correctness checking."""
    f32 = lambda x: x.astype(jnp.float32)
    log_probs, old_log_probs, log_probs_ref = map(
        f32, (log_probs, old_log_probs, log_probs_ref))
    action_mask, advantages, returns, values, entropy = map(
        f32, (action_mask, advantages, returns, values, entropy))

    log_ratio = (log_probs_ref - log_probs) * action_mask
    kl = jnp.exp(log_ratio) - log_ratio - 1.0
    ratio = jnp.exp(log_probs - old_log_probs)
    surr1 = ratio * advantages
    surr2 = jnp.clip(ratio, 1 - CLIP_EPS, 1 + CLIP_EPS) * advantages
    policy_loss = -jnp.minimum(surr1, surr2)

    def masked_mean(t, m, axis):
        return (t * m).sum(axis=axis) / jnp.maximum(m.sum(axis=axis), 1.0)

    total = masked_mean(policy_loss + KL_WEIGHT * kl, action_mask, -1).mean()
    entropy_loss = -ENTROPY_WEIGHT * masked_mean(entropy, action_mask, -1).mean()
    value_loss = jnp.mean((values - returns) ** 2)
    total = total + entropy_loss + VALUE_WEIGHT * value_loss
    metrics = {
        "policy_loss": masked_mean(policy_loss, action_mask, -1).mean(),
        "kl_divergence": kl.mean(),
        "ratio_mean": ratio.mean(),
        "advantages_mean": advantages.mean(),
        "entropy_loss": entropy_loss,
        "value_loss": value_loss,
    }
    return total, metrics


def _make_inputs(key, B, T, dtype=jnp.float32):
    ks = jax.random.split(key, 8)
    log_probs = -jnp.abs(jax.random.normal(ks[0], (B, T), jnp.float32))
    old_log_probs = -jnp.abs(jax.random.normal(ks[1], (B, T), jnp.float32))
    log_probs_ref = -jnp.abs(jax.random.normal(ks[2], (B, T), jnp.float32))
    action_mask = (jax.random.uniform(ks[3], (B, T)) > 0.3).astype(jnp.float32)
    advantages = jax.random.normal(ks[4], (B, T), jnp.float32)
    returns = jax.random.normal(ks[5], (B, T), jnp.float32)
    values = jax.random.normal(ks[6], (B, T), jnp.float32)
    entropy = jnp.abs(jax.random.normal(ks[7], (B, T), jnp.float32))
    args = (log_probs, old_log_probs, log_probs_ref, action_mask,
            advantages, returns, values, entropy)
    return tuple(a.astype(dtype) for a in args)


if __name__ == "__main__":
    key = jax.random.PRNGKey(0)
    k1, k2, k3 = jax.random.split(key, 3)

    cases = [
        # tiny ragged shape: pad fallback + epilogue ratio correction
        (k1, 2, 8, jnp.float32, 1e-5),
        # no-pad path, 2 batch blocks x 2 seq steps, 16-chunk fold per step
        (k2, 16, 4096, jnp.float32, 1e-5),
        # bf16 inputs end-to-end (kernel upcasts; ref sees same quantized data)
        (k3, 16, 2048, jnp.bfloat16, 1e-4),
    ]

    for kk, B, T, dtype, tol in cases:
        args = _make_inputs(kk, B, T, dtype)

        total, metrics = grpo_loss(*args)
        total = jax.block_until_ready(total)
        for v in metrics.values():
            jax.block_until_ready(v)

        ref_total, ref_metrics = _reference(*args)
        assert jnp.allclose(total, ref_total, rtol=tol, atol=tol), (
            B, T, dtype, float(total), float(ref_total))
        for name in metrics:
            assert jnp.allclose(metrics[name], ref_metrics[name],
                                rtol=tol, atol=tol), (B, T, dtype, name)

    print("KERNEL_OK")
</pallas_src>

<mosaic_0001>
module attributes {stable_mosaic.version = 11 : i64} {
  func.func @kernel(%arg0: i32, %arg1: i32, %arg2: memref<8x128xf32, #tpu.memory_space<vmem>>, %arg3: memref<8x128xf32, #tpu.memory_space<vmem>>, %arg4: memref<8x128xf32, #tpu.memory_space<vmem>>, %arg5: memref<8x128xf32, #tpu.memory_space<vmem>>, %arg6: memref<8x128xf32, #tpu.memory_space<vmem>>, %arg7: memref<8x128xf32, #tpu.memory_space<vmem>>, %arg8: memref<8x128xf32, #tpu.memory_space<vmem>>, %arg9: memref<8x128xf32, #tpu.memory_space<vmem>>, %arg10: memref<8x128xf32, #tpu.memory_space<vmem>>, %arg11: memref<8x128xf32, #tpu.memory_space<vmem>>, %arg12: memref<8x128xf32, #tpu.memory_space<vmem>>, %arg13: memref<8x128xf32, #tpu.memory_space<vmem>>, %arg14: memref<8x128xf32, #tpu.memory_space<vmem>>, %arg15: memref<8x128xf32, #tpu.memory_space<vmem>>, %arg16: memref<8x128xf32, #tpu.memory_space<vmem>>, %arg17: memref<8x128xf32, #tpu.memory_space<vmem>>, %arg18: memref<8x128xf32, #tpu.memory_space<vmem>>) attributes {dimension_semantics = [#tpu.dimension_semantics<parallel>, #tpu.dimension_semantics<arbitrary>], iteration_bounds = array<i64: 1, 1>, scalar_prefetch = 0 : i64, scratch_operands = 8 : i64, tpu.core_type = #tpu.core_type<tc>, window_params = [{transform_indices = @transform_0, window_bounds = array<i64: 8, 128>}, {transform_indices = @transform_1, window_bounds = array<i64: 8, 128>}, {transform_indices = @transform_2, window_bounds = array<i64: 8, 128>}, {transform_indices = @transform_3, window_bounds = array<i64: 8, 128>}, {transform_indices = @transform_4, window_bounds = array<i64: 8, 128>}, {transform_indices = @transform_5, window_bounds = array<i64: 8, 128>}, {transform_indices = @transform_6, window_bounds = array<i64: 8, 128>}, {transform_indices = @transform_7, window_bounds = array<i64: 8, 128>}, {transform_indices = @transform_8, window_bounds = array<i64: 8, 128>}]} {
    %c0_i32 = arith.constant 0 : i32
    %0 = arith.cmpi eq, %arg1, %c0_i32 : i32
    %1 = arith.extui %0 : i1 to i32
    %c0_i32_0 = arith.constant 0 : i32
    %2 = arith.cmpi ne, %1, %c0_i32_0 : i32
    scf.if %2 {
      %cst_54 = arith.constant 0.000000e+00 : f32
      %69 = vector.broadcast %cst_54 : f32 to vector<8x128xf32>
      %c0_55 = arith.constant 0 : index
      %c0_56 = arith.constant 0 : index
      %70 = vector.load %arg11[%c0_55, %c0_56] : memref<8x128xf32, #tpu.memory_space<vmem>>, vector<8x128xf32>
      tpu.vector_store %arg11[%c0_55, %c0_56], %69 {strides = array<i32>} : memref<8x128xf32, #tpu.memory_space<vmem>>, vector<8x128xf32>,
      %cst_57 = arith.constant 0.000000e+00 : f32
      %71 = vector.broadcast %cst_57 : f32 to vector<8x128xf32>
      %c0_58 = arith.constant 0 : index
      %c0_59 = arith.constant 0 : index
      %72 = vector.load %arg12[%c0_58, %c0_59] : memref<8x128xf32, #tpu.memory_space<vmem>>, vector<8x128xf32>
      tpu.vector_store %arg12[%c0_58, %c0_59], %71 {strides = array<i32>} : memref<8x128xf32, #tpu.memory_space<vmem>>, vector<8x128xf32>,
      %cst_60 = arith.constant 0.000000e+00 : f32
      %73 = vector.broadcast %cst_60 : f32 to vector<8x128xf32>
      %c0_61 = arith.constant 0 : index
      %c0_62 = arith.constant 0 : index
      %74 = vector.load %arg13[%c0_61, %c0_62] : memref<8x128xf32, #tpu.memory_space<vmem>>, vector<8x128xf32>
      tpu.vector_store %arg13[%c0_61, %c0_62], %73 {strides = array<i32>} : memref<8x128xf32, #tpu.memory_space<vmem>>, vector<8x128xf32>,
      %cst_63 = arith.constant 0.000000e+00 : f32
      %75 = vector.broadcast %cst_63 : f32 to vector<8x128xf32>
      %c0_64 = arith.constant 0 : index
      %c0_65 = arith.constant 0 : index
      %76 = vector.load %arg14[%c0_64, %c0_65] : memref<8x128xf32, #tpu.memory_space<vmem>>, vector<8x128xf32>
      tpu.vector_store %arg14[%c0_64, %c0_65], %75 {strides = array<i32>} : memref<8x128xf32, #tpu.memory_space<vmem>>, vector<8x128xf32>,
      %cst_66 = arith.constant 0.000000e+00 : f32
      %77 = vector.broadcast %cst_66 : f32 to vector<8x128xf32>
      %c0_67 = arith.constant 0 : index
      %c0_68 = arith.constant 0 : index
      %78 = vector.load %arg15[%c0_67, %c0_68] : memref<8x128xf32, #tpu.memory_space<vmem>>, vector<8x128xf32>
      tpu.vector_store %arg15[%c0_67, %c0_68], %77 {strides = array<i32>} : memref<8x128xf32, #tpu.memory_space<vmem>>, vector<8x128xf32>,
      %cst_69 = arith.constant 0.000000e+00 : f32
      %79 = vector.broadcast %cst_69 : f32 to vector<8x128xf32>
      %c0_70 = arith.constant 0 : index
      %c0_71 = arith.constant 0 : index
      %80 = vector.load %arg16[%c0_70, %c0_71] : memref<8x128xf32, #tpu.memory_space<vmem>>, vector<8x128xf32>
      tpu.vector_store %arg16[%c0_70, %c0_71], %79 {strides = array<i32>} : memref<8x128xf32, #tpu.memory_space<vmem>>, vector<8x128xf32>,
      %cst_72 = arith.constant 0.000000e+00 : f32
      %81 = vector.broadcast %cst_72 : f32 to vector<8x128xf32>
      %c0_73 = arith.constant 0 : index
      %c0_74 = arith.constant 0 : index
      %82 = vector.load %arg17[%c0_73, %c0_74] : memref<8x128xf32, #tpu.memory_space<vmem>>, vector<8x128xf32>
      tpu.vector_store %arg17[%c0_73, %c0_74], %81 {strides = array<i32>} : memref<8x128xf32, #tpu.memory_space<vmem>>, vector<8x128xf32>,
      %cst_75 = arith.constant 0.000000e+00 : f32
      %83 = vector.broadcast %cst_75 : f32 to vector<8x128xf32>
      %c0_76 = arith.constant 0 : index
      %c0_77 = arith.constant 0 : index
      %84 = vector.load %arg18[%c0_76, %c0_77] : memref<8x128xf32, #tpu.memory_space<vmem>>, vector<8x128xf32>
      tpu.vector_store %arg18[%c0_76, %c0_77], %83 {strides = array<i32>} : memref<8x128xf32, #tpu.memory_space<vmem>>, vector<8x128xf32>,
    } else {
    }
    %cst = arith.constant 0.000000e+00 : f32
    %3 = vector.broadcast %cst : f32 to vector<8x128xf32>
    %c0 = arith.constant 0 : index
    %c0_1 = arith.constant 0 : index
    %4 = vector.load %arg2[%c0, %c0_1] : memref<8x128xf32, #tpu.memory_space<vmem>>, vector<8x128xf32>
    %c0_2 = arith.constant 0 : index
    %c0_3 = arith.constant 0 : index
    %5 = vector.load %arg3[%c0_2, %c0_3] : memref<8x128xf32, #tpu.memory_space<vmem>>, vector<8x128xf32>
    %c0_4 = arith.constant 0 : index
    %c0_5 = arith.constant 0 : index
    %6 = vector.load %arg4[%c0_4, %c0_5] : memref<8x128xf32, #tpu.memory_space<vmem>>, vector<8x128xf32>
    %c0_6 = arith.constant 0 : index
    %c0_7 = arith.constant 0 : index
    %7 = vector.load %arg5[%c0_6, %c0_7] : memref<8x128xf32, #tpu.memory_space<vmem>>, vector<8x128xf32>
    %c0_8 = arith.constant 0 : index
    %c0_9 = arith.constant 0 : index
    %8 = vector.load %arg6[%c0_8, %c0_9] : memref<8x128xf32, #tpu.memory_space<vmem>>, vector<8x128xf32>
    %c0_10 = arith.constant 0 : index
    %c0_11 = arith.constant 0 : index
    %9 = vector.load %arg7[%c0_10, %c0_11] : memref<8x128xf32, #tpu.memory_space<vmem>>, vector<8x128xf32>
    %c0_12 = arith.constant 0 : index
    %c0_13 = arith.constant 0 : index
    %10 = vector.load %arg8[%c0_12, %c0_13] : memref<8x128xf32, #tpu.memory_space<vmem>>, vector<8x128xf32>
    %c0_14 = arith.constant 0 : index
    %c0_15 = arith.constant 0 : index
    %11 = vector.load %arg9[%c0_14, %c0_15] : memref<8x128xf32, #tpu.memory_space<vmem>>, vector<8x128xf32>
    %12 = arith.subf %6, %4 : vector<8x128xf32>
    %13 = arith.mulf %12, %7 : vector<8x128xf32>
    %14 = math.exp %13 : vector<8x128xf32>
    %15 = arith.subf %14, %13 : vector<8x128xf32>
    %cst_16 = arith.constant 1.000000e+00 : f32
    %16 = vector.broadcast %cst_16 : f32 to vector<8x128xf32>
    %17 = arith.subf %15, %16 : vector<8x128xf32>
    %18 = arith.subf %4, %5 : vector<8x128xf32>
    %19 = math.exp %18 : vector<8x128xf32>
    %20 = arith.mulf %19, %8 : vector<8x128xf32>
    %cst_17 = arith.constant 8.000000e-01 : f32
    %cst_18 = arith.constant 1.200000e+00 : f32
    %21 = vector.broadcast %cst_17 : f32 to vector<8x128xf32>
    %22 = arith.maximumf %21, %19 : vector<8x128xf32>
    %23 = vector.broadcast %cst_18 : f32 to vector<8x128xf32>
    %24 = arith.minimumf %23, %22 : vector<8x128xf32>
    %25 = arith.mulf %24, %8 : vector<8x128xf32>
    %26 = arith.minimumf %20, %25 : vector<8x128xf32>
    %cst_19 = arith.constant 0.000000e+00 : f32
    %27 = vector.broadcast %cst_19 : f32 to vector<8x128xf32>
    %28 = arith.subf %27, %26 : vector<8x128xf32>
    %29 = arith.subf %10, %9 : vector<8x128xf32>
    %30 = arith.addf %3, %7 : vector<8x128xf32>
    %31 = arith.mulf %28, %7 : vector<8x128xf32>
    %32 = arith.addf %3, %31 : vector<8x128xf32>
    %33 = arith.mulf %17, %7 : vector<8x128xf32>
    %34 = arith.addf %3, %33 : vector<8x128xf32>
    %35 = arith.mulf %11, %7 : vector<8x128xf32>
    %36 = arith.addf %3, %35 : vector<8x128xf32>
    %37 = arith.addf %3, %17 : vector<8x128xf32>
    %38 = arith.addf %3, %19 : vector<8x128xf32>
    %39 = arith.addf %3, %8 : vector<8x128xf32>
    %40 = arith.mulf %29, %29 : vector<8x128xf32>
    %41 = arith.addf %3, %40 : vector<8x128xf32>
    %c0_20 = arith.constant 0 : index
    %c0_21 = arith.constant 0 : index
    %42 = vector.load %arg11[%c0_20, %c0_21] : memref<8x128xf32, #tpu.memory_space<vmem>>, vector<8x128xf32>
    %43 = arith.addf %42, %30 : vector<8x128xf32>
    %c0_22 = arith.constant 0 : index
    %c0_23 = arith.constant 0 : index
    %44 = vector.load %arg11[%c0_22, %c0_23] : memref<8x128xf32, #tpu.memory_space<vmem>>, vector<8x128xf32>
    tpu.vector_store %arg11[%c0_22, %c0_23], %43 {strides = array<i32>} : memref<8x128xf32, #tpu.memory_space<vmem>>, vector<8x128xf32>,
    %c0_24 = arith.constant 0 : index
    %c0_25 = arith.constant 0 : index
    %45 = vector.load %arg12[%c0_24, %c0_25] : memref<8x128xf32, #tpu.memory_space<vmem>>, vector<8x128xf32>
    %46 = arith.addf %45, %32 : vector<8x128xf32>
    %c0_26 = arith.constant 0 : index
    %c0_27 = arith.constant 0 : index
    %47 = vector.load %arg12[%c0_26, %c0_27] : memref<8x128xf32, #tpu.memory_space<vmem>>, vector<8x128xf32>
    tpu.vector_store %arg12[%c0_26, %c0_27], %46 {strides = array<i32>} : memref<8x128xf32, #tpu.memory_space<vmem>>, vector<8x128xf32>,
    %c0_28 = arith.constant 0 : index
    %c0_29 = arith.constant 0 : index
    %48 = vector.load %arg13[%c0_28, %c0_29] : memref<8x128xf32, #tpu.memory_space<vmem>>, vector<8x128xf32>
    %49 = arith.addf %48, %34 : vector<8x128xf32>
    %c0_30 = arith.constant 0 : index
    %c0_31 = arith.constant 0 : index
    %50 = vector.load %arg13[%c0_30, %c0_31] : memref<8x128xf32, #tpu.memory_space<vmem>>, vector<8x128xf32>
    tpu.vector_store %arg13[%c0_30, %c0_31], %49 {strides = array<i32>} : memref<8x128xf32, #tpu.memory_space<vmem>>, vector<8x128xf32>,
    %c0_32 = arith.constant 0 : index
    %c0_33 = arith.constant 0 : index
    %51 = vector.load %arg14[%c0_32, %c0_33] : memref<8x128xf32, #tpu.memory_space<vmem>>, vector<8x128xf32>
    %52 = arith.addf %51, %36 : vector<8x128xf32>
    %c0_34 = arith.constant 0 : index
    %c0_35 = arith.constant 0 : index
    %53 = vector.load %arg14[%c0_34, %c0_35] : memref<8x128xf32, #tpu.memory_space<vmem>>, vector<8x128xf32>
    tpu.vector_store %arg14[%c0_34, %c0_35], %52 {strides = array<i32>} : memref<8x128xf32, #tpu.memory_space<vmem>>, vector<8x128xf32>,
    %c0_36 = arith.constant 0 : index
    %c0_37 = arith.constant 0 : index
    %54 = vector.load %arg15[%c0_36, %c0_37] : memref<8x128xf32, #tpu.memory_space<vmem>>, vector<8x128xf32>
    %55 = arith.addf %54, %37 : vector<8x128xf32>
    %c0_38 = arith.constant 0 : index
    %c0_39 = arith.constant 0 : index
    %56 = vector.load %arg15[%c0_38, %c0_39] : memref<8x128xf32, #tpu.memory_space<vmem>>, vector<8x128xf32>
    tpu.vector_store %arg15[%c0_38, %c0_39], %55 {strides = array<i32>} : memref<8x128xf32, #tpu.memory_space<vmem>>, vector<8x128xf32>,
    %c0_40 = arith.constant 0 : index
    %c0_41 = arith.constant 0 : index
    %57 = vector.load %arg16[%c0_40, %c0_41] : memref<8x128xf32, #tpu.memory_space<vmem>>, vector<8x128xf32>
    %58 = arith.addf %57, %38 : vector<8x128xf32>
    %c0_42 = arith.constant 0 : index
    %c0_43 = arith.constant 0 : index
    %59 = vector.load %arg16[%c0_42, %c0_43] : memref<8x128xf32, #tpu.memory_space<vmem>>, vector<8x128xf32>
    tpu.vector_store %arg16[%c0_42, %c0_43], %58 {strides = array<i32>} : memref<8x128xf32, #tpu.memory_space<vmem>>, vector<8x128xf32>,
    %c0_44 = arith.constant 0 : index
    %c0_45 = arith.constant 0 : index
    %60 = vector.load %arg17[%c0_44, %c0_45] : memref<8x128xf32, #tpu.memory_space<vmem>>, vector<8x128xf32>
    %61 = arith.addf %60, %39 : vector<8x128xf32>
    %c0_46 = arith.constant 0 : index
    %c0_47 = arith.constant 0 : index
    %62 = vector.load %arg17[%c0_46, %c0_47] : memref<8x128xf32, #tpu.memory_space<vmem>>, vector<8x128xf32>
    tpu.vector_store %arg17[%c0_46, %c0_47], %61 {strides = array<i32>} : memref<8x128xf32, #tpu.memory_space<vmem>>, vector<8x128xf32>,
    %c0_48 = arith.constant 0 : index
    %c0_49 = arith.constant 0 : index
    %63 = vector.load %arg18[%c0_48, %c0_49] : memref<8x128xf32, #tpu.memory_space<vmem>>, vector<8x128xf32>
    %64 = arith.addf %63, %41 : vector<8x128xf32>
    %c0_50 = arith.constant 0 : index
    %c0_51 = arith.constant 0 : index
    %65 = vector.load %arg18[%c0_50, %c0_51] : memref<8x128xf32, #tpu.memory_space<vmem>>, vector<8x128xf32>
    tpu.vector_store %arg18[%c0_50, %c0_51], %64 {strides = array<i32>} : memref<8x128xf32, #tpu.memory_space<vmem>>, vector<8x128xf32>,
    %c0_i32_52 = arith.constant 0 : i32
    %66 = arith.cmpi eq, %arg1, %c0_i32_52 : i32
    %67 = arith.extui %66 : i1 to i32
    %c0_i32_53 = arith.constant 0 : i32
    %68 = arith.cmpi ne, %67, %c0_i32_53 : i32
    scf.if %68 {
      %69 = tpu.iota {dimensions = array<i32: 1>} : vector<8x128xi32>
      %cst_54 = arith.constant 0.000000e+00 : f32
      %70 = vector.broadcast %cst_54 : f32 to vector<8x128xf32>
      %c0_55 = arith.constant 0 : index
      %c0_56 = arith.constant 0 : index
      %71 = vector.load %arg11[%c0_55, %c0_56] : memref<8x128xf32, #tpu.memory_space<vmem>>, vector<8x128xf32>
      %cst_57 = arith.constant dense<0.000000e+00> : vector<8xf32>
      %72 = vector.multi_reduction <add>, %71, %cst_57 [1] : vector<8x128xf32> to vector<8xf32>
      %73 = vector.shape_cast %72 : vector<8xf32> to vector<8x1xf32>
      %c0_i32_58 = arith.constant 0 : i32
      %74 = vector.broadcast %c0_i32_58 : i32 to vector<8x128xi32>
      %75 = arith.cmpi eq, %69, %74 : vector<8x128xi32>
      %76 = vector.shape_cast %73 : vector<8x1xf32> to vector<8x1xf32>
      %77 = vector.broadcast %76 : vector<8x1xf32> to vector<8x128xf32>
      %78 = arith.select %75, %77, %70 : vector<8x128xi1>, vector<8x128xf32>
      %c0_59 = arith.constant 0 : index
      %c0_60 = arith.constant 0 : index
      %79 = vector.load %arg12[%c0_59, %c0_60] : memref<8x128xf32, #tpu.memory_space<vmem>>, vector<8x128xf32>
      %cst_61 = arith.constant dense<0.000000e+00> : vector<8xf32>
      %80 = vector.multi_reduction <add>, %79, %cst_61 [1] : vector<8x128xf32> to vector<8xf32>
      %81 = vector.shape_cast %80 : vector<8xf32> to vector<8x1xf32>
      %c1_i32 = arith.constant 1 : i32
      %82 = vector.broadcast %c1_i32 : i32 to vector<8x128xi32>
      %83 = arith.cmpi eq, %69, %82 : vector<8x128xi32>
      %84 = vector.shape_cast %81 : vector<8x1xf32> to vector<8x1xf32>
      %85 = vector.broadcast %84 : vector<8x1xf32> to vector<8x128xf32>
      %86 = arith.select %83, %85, %78 : vector<8x128xi1>, vector<8x128xf32>
      %c0_62 = arith.constant 0 : index
      %c0_63 = arith.constant 0 : index
      %87 = vector.load %arg13[%c0_62, %c0_63] : memref<8x128xf32, #tpu.memory_space<vmem>>, vector<8x128xf32>
      %cst_64 = arith.constant dense<0.000000e+00> : vector<8xf32>
      %88 = vector.multi_reduction <add>, %87, %cst_64 [1] : vector<8x128xf32> to vector<8xf32>
      %89 = vector.shape_cast %88 : vector<8xf32> to vector<8x1xf32>
      %c2_i32 = arith.constant 2 : i32
      %90 = vector.broadcast %c2_i32 : i32 to vector<8x128xi32>
      %91 = arith.cmpi eq, %69, %90 : vector<8x128xi32>
      %92 = vector.shape_cast %89 : vector<8x1xf32> to vector<8x1xf32>
      %93 = vector.broadcast %92 : vector<8x1xf32> to vector<8x128xf32>
      %94 = arith.select %91, %93, %86 : vector<8x128xi1>, vector<8x128xf32>
      %c0_65 = arith.constant 0 : index
      %c0_66 = arith.constant 0 : index
      %95 = vector.load %arg14[%c0_65, %c0_66] : memref<8x128xf32, #tpu.memory_space<vmem>>, vector<8x128xf32>
      %cst_67 = arith.constant dense<0.000000e+00> : vector<8xf32>
      %96 = vector.multi_reduction <add>, %95, %cst_67 [1] : vector<8x128xf32> to vector<8xf32>
      %97 = vector.shape_cast %96 : vector<8xf32> to vector<8x1xf32>
      %c3_i32 = arith.constant 3 : i32
      %98 = vector.broadcast %c3_i32 : i32 to vector<8x128xi32>
      %99 = arith.cmpi eq, %69, %98 : vector<8x128xi32>
      %100 = vector.shape_cast %97 : vector<8x1xf32> to vector<8x1xf32>
      %101 = vector.broadcast %100 : vector<8x1xf32> to vector<8x128xf32>
      %102 = arith.select %99, %101, %94 : vector<8x128xi1>, vector<8x128xf32>
      %c0_68 = arith.constant 0 : index
      %c0_69 = arith.constant 0 : index
      %103 = vector.load %arg15[%c0_68, %c0_69] : memref<8x128xf32, #tpu.memory_space<vmem>>, vector<8x128xf32>
      %cst_70 = arith.constant dense<0.000000e+00> : vector<8xf32>
      %104 = vector.multi_reduction <add>, %103, %cst_70 [1] : vector<8x128xf32> to vector<8xf32>
      %105 = vector.shape_cast %104 : vector<8xf32> to vector<8x1xf32>
      %c4_i32 = arith.constant 4 : i32
      %106 = vector.broadcast %c4_i32 : i32 to vector<8x128xi32>
      %107 = arith.cmpi eq, %69, %106 : vector<8x128xi32>
      %108 = vector.shape_cast %105 : vector<8x1xf32> to vector<8x1xf32>
      %109 = vector.broadcast %108 : vector<8x1xf32> to vector<8x128xf32>
      %110 = arith.select %107, %109, %102 : vector<8x128xi1>, vector<8x128xf32>
      %c0_71 = arith.constant 0 : index
      %c0_72 = arith.constant 0 : index
      %111 = vector.load %arg16[%c0_71, %c0_72] : memref<8x128xf32, #tpu.memory_space<vmem>>, vector<8x128xf32>
      %cst_73 = arith.constant dense<0.000000e+00> : vector<8xf32>
      %112 = vector.multi_reduction <add>, %111, %cst_73 [1] : vector<8x128xf32> to vector<8xf32>
      %113 = vector.shape_cast %112 : vector<8xf32> to vector<8x1xf32>
      %c5_i32 = arith.constant 5 : i32
      %114 = vector.broadcast %c5_i32 : i32 to vector<8x128xi32>
      %115 = arith.cmpi eq, %69, %114 : vector<8x128xi32>
      %116 = vector.shape_cast %113 : vector<8x1xf32> to vector<8x1xf32>
      %117 = vector.broadcast %116 : vector<8x1xf32> to vector<8x128xf32>
      %118 = arith.select %115, %117, %110 : vector<8x128xi1>, vector<8x128xf32>
      %c0_74 = arith.constant 0 : index
      %c0_75 = arith.constant 0 : index
      %119 = vector.load %arg17[%c0_74, %c0_75] : memref<8x128xf32, #tpu.memory_space<vmem>>, vector<8x128xf32>
      %cst_76 = arith.constant dense<0.000000e+00> : vector<8xf32>
      %120 = vector.multi_reduction <add>, %119, %cst_76 [1] : vector<8x128xf32> to vector<8xf32>
      %121 = vector.shape_cast %120 : vector<8xf32> to vector<8x1xf32>
      %c6_i32 = arith.constant 6 : i32
      %122 = vector.broadcast %c6_i32 : i32 to vector<8x128xi32>
      %123 = arith.cmpi eq, %69, %122 : vector<8x128xi32>
      %124 = vector.shape_cast %121 : vector<8x1xf32> to vector<8x1xf32>
      %125 = vector.broadcast %124 : vector<8x1xf32> to vector<8x128xf32>
      %126 = arith.select %123, %125, %118 : vector<8x128xi1>, vector<8x128xf32>
      %c0_77 = arith.constant 0 : index
      %c0_78 = arith.constant 0 : index
      %127 = vector.load %arg18[%c0_77, %c0_78] : memref<8x128xf32, #tpu.memory_space<vmem>>, vector<8x128xf32>
      %cst_79 = arith.constant dense<0.000000e+00> : vector<8xf32>
      %128 = vector.multi_reduction <add>, %127, %cst_79 [1] : vector<8x128xf32> to vector<8xf32>
      %129 = vector.shape_cast %128 : vector<8xf32> to vector<8x1xf32>
      %c7_i32 = arith.constant 7 : i32
      %130 = vector.broadcast %c7_i32 : i32 to vector<8x128xi32>
      %131 = arith.cmpi eq, %69, %130 : vector<8x128xi32>
      %132 = vector.shape_cast %129 : vector<8x1xf32> to vector<8x1xf32>
      %133 = vector.broadcast %132 : vector<8x1xf32> to vector<8x128xf32>
      %134 = arith.select %131, %133, %126 : vector<8x128xi1>, vector<8x128xf32>
      %c0_80 = arith.constant 0 : index
      %c0_81 = arith.constant 0 : index
      %135 = vector.load %arg10[%c0_80, %c0_81] : memref<8x128xf32, #tpu.memory_space<vmem>>, vector<8x128xf32>
      tpu.vector_store %arg10[%c0_80, %c0_81], %134 {strides = array<i32>} : memref<8x128xf32, #tpu.memory_space<vmem>>, vector<8x128xf32>,
    } else {
    }
    return
  }
  func.func @transform_0(%arg0: i32, %arg1: i32) -> (i32, i32) {
    %c0_i32 = arith.constant 0 : i32
    return %arg0, %arg1 : i32, i32
  }
  func.func @transform_1(%arg0: i32, %arg1: i32) -> (i32, i32) {
    %c0_i32 = arith.constant 0 : i32
    return %arg0, %arg1 : i32, i32
  }
  func.func @transform_2(%arg0: i32, %arg1: i32) -> (i32, i32) {
    %c0_i32 = arith.constant 0 : i32
    return %arg0, %arg1 : i32, i32
  }
  func.func @transform_3(%arg0: i32, %arg1: i32) -> (i32, i32) {
    %c0_i32 = arith.constant 0 : i32
    return %arg0, %arg1 : i32, i32
  }
  func.func @transform_4(%arg0: i32, %arg1: i32) -> (i32, i32) {
    %c0_i32 = arith.constant 0 : i32
    return %arg0, %arg1 : i32, i32
  }
  func.func @transform_5(%arg0: i32, %arg1: i32) -> (i32, i32) {
    %c0_i32 = arith.constant 0 : i32
    return %arg0, %arg1 : i32, i32
  }
  func.func @transform_6(%arg0: i32, %arg1: i32) -> (i32, i32) {
    %c0_i32 = arith.constant 0 : i32
    return %arg0, %arg1 : i32, i32
  }
  func.func @transform_7(%arg0: i32, %arg1: i32) -> (i32, i32) {
    %c0_i32 = arith.constant 0 : i32
    return %arg0, %arg1 : i32, i32
  }
  func.func @transform_8(%arg0: i32, %arg1: i32) -> (i32, i32) {
    %c0_i32 = arith.constant 0 : i32
    %c0_i32_0 = arith.constant 0 : i32
    return %arg0, %c0_i32 : i32, i32
  }
}

</mosaic_0001>

<bundles_post_ra>
// kernel: grpo_loss.1
= control target key start
LH: loop header
LB: loop body
LE: loop exit
PB: predicated region body
PF: predicated region fallthrough
CT: control target
= control target key end

     0   :  { %v104_v28 = vlaneseq  ;;  %s228_s3 = inlined_call_operand.vmem [shape: f32[8,128], index: 3, kind: input, shape index: {}]   ;;  %s229_s7 = inlined_call_operand.vmem [shape: f32[8,128], index: 7, kind: input, shape index: {}]   ;;  %s230_s0 = inlined_call_operand.vmem [shape: f32[8,128], index: 0, kind: input, shape index: {}]   ;;  %s231_s1 = inlined_call_operand.vmem [shape: f32[8,128], index: 1, kind: input, shape index: {}]   ;;  %s232_s2 = inlined_call_operand.vmem [shape: f32[8,128], index: 2, kind: input, shape index: {}]   ;;  %s233_s4 = inlined_call_operand.vmem [shape: f32[8,128], index: 4, kind: input, shape index: {}]   ;;  %s234_s5 = inlined_call_operand.vmem [shape: f32[8,128], index: 5, kind: input, shape index: {}]   ;;  %s235_s6 = inlined_call_operand.vmem [shape: f32[8,128], index: 6, kind: input, shape index: {}]   ;;  %s236_s8 = inlined_call_operand.vmem [shape: f32[8,128], index: 8, kind: output, shape index: {}]  }
   0x1   :  { %v44_v0 = vld [vmem:[%s228_s3] sm:$0xff] }
   0x2   :  { %v48_v1 = vld [vmem:[%s229_s7] sm:$0xff]  ;;  %107 = vadd.xlane.f32.xlu0 %v44_v0  ;;  %v105_v30 = vand.u32 127, %v104_v28 }
   0x3   :  { %v41_v2 = vld [vmem:[%s230_s0] sm:$0xff]  ;;  %v70_v3 = vmul.f32 %v48_v1, %v44_v0 }
   0x4   :  { %v42_v4 = vld [vmem:[%s231_s1] sm:$0xff]  ;;  %vm109_vm0 = vcmp.eq.s32.totalorder %v105_v30, 0  ;;  %vm114_vm1 = vcmp.eq.s32.totalorder %v105_v30, 1  ;;  %vm119_vm2 = vcmp.eq.s32.totalorder %v105_v30, 2  ;;  %vm124_vm3 = vcmp.eq.s32.totalorder %v105_v30, 3 }
   0x5   :  { %v43_v5 = vld [vmem:[%s232_s2] sm:$0xff]  ;;  %v55_v6 = vsub.f32 %v41_v2, %v42_v4  ;;  %122 = vadd.xlane.f32.xlu1 %v70_v3  ;;  %vm129_vm4 = vcmp.eq.s32.totalorder %v105_v30, 4  ;;  %vm134_vm5 = vcmp.eq.s32.totalorder %v105_v30, 5  ;;  %vm139_vm6 = vcmp.eq.s32.totalorder %v105_v30, 6 }
   0x6   :  { %v49_v7 = vsub.f32 %v43_v5, %v41_v2  ;;  %v45_v12 = vld [vmem:[%s233_s4] sm:$0xff]  ;;  %vm144_vm7 = vcmp.eq.s32.totalorder %v105_v30, 7 }
   0x7   :  { %v56_v8 = vmul.f32 1.442695, %v55_v6  ;;  %v46_v20 = vld [vmem:[%s234_s5] sm:$0xff] }
   0x8   :  { %v50_v9 = vmul.f32 %v49_v7, %v44_v0  ;;  %v47_v21 = vld [vmem:[%s235_s6] sm:$0xff] }
   0x9   :  { %152 = vpow2.f32 %v56_v8  ;;  %v64_v25 = vsub.f32 %v47_v21, %v46_v20 }
   0xa   :  { %v51_v10 = vmul.f32 1.442695, %v50_v9 }
   0xb   :  { %v75_v27 = vmul.f32 %v64_v25, %v64_v25 }
   0xc   :  { %154 = vpow2.f32 %v51_v10 }
  0x13   :  { %v153_v11 = vpop.eup %152 }
  0x14   :  { %v59_v13 = vmax.f32 %v153_v11, 0.8  ;;  %v58_v15 = vmul.f32 %v153_v11, %v45_v12 }
  0x16   :  { %v155_v14 = vpop.eup %154  ;;  %v60_v16 = vmin.f32 %v59_v13, 1.2 }
  0x17   :  { %v53_v17 = vsub.f32 %v155_v14, %v50_v9 }
  0x18   :  { %v61_v18 = vmul.f32 %v60_v16, %v45_v12 }
  0x19   :  { %v151_v19 = vadd.f32 -1.0, %v53_v17 }
  0x1a   :  { %v62_v22 = vmin.f32 %v58_v15, %v61_v18 }
  0x1b   :  { %v68_v23 = vmul.f32 %v151_v19, %v44_v0 }
  0x1c   :  { %v63_v24 = vsub.f32 0.0, %v62_v22 }
  0x1d   :  { %117 = vadd.xlane.f32.xlu1 %v68_v23 }
  0x1e   :  { %v66_v26 = vmul.f32 %v63_v24, %v44_v0 }
  0x20   :  { %112 = vadd.xlane.f32.xlu0 %v66_v26 }
  0x21   :  { %132 = vadd.xlane.f32.xlu1 %v153_v11 }
  0x24   :  { %127 = vadd.xlane.f32.xlu0 %v151_v19 }
  0x25   :  { %142 = vadd.xlane.f32.xlu1 %v75_v27 }
  0x28   :  { %137 = vadd.xlane.f32.xlu0 %v45_v12 }
  0x8f   :  { %v108_v31 = vpop.xlane.xlu0 %107 }
  0x90   :  { %v110_v33 = vsel %vm109_vm0, %v108_v31, 0.0 }
  0x92   :  { %v123_v29 = vpop.xlane.xlu1 %122 }
  0xaa   :  { %v118_v32 = vpop.xlane.xlu1 %117 }
  0xad   :  { %v113_v34 = vpop.xlane.xlu0 %112 }
  0xae   :  { %v115_v35 = vsel %vm114_vm1, %v113_v34, %v110_v33  ;;  %v133_v36 = vpop.xlane.xlu1 %132 }
  0xaf   :  { %v120_v37 = vsel %vm119_vm2, %v118_v32, %v115_v35 }
  0xb0   :  { %v125_v38 = vsel %vm124_vm3, %v123_v29, %v120_v37 }
  0xb1   :  { %v128_v39 = vpop.xlane.xlu0 %127 }
  0xb2   :  { %v130_v40 = vsel %vm129_vm4, %v128_v39, %v125_v38  ;;  %v143_v41 = vpop.xlane.xlu1 %142 }
  0xb3   :  { %v135_v42 = vsel %vm134_vm5, %v133_v36, %v130_v40 }
  0xb5   :  { %v138_v43 = vpop.xlane.xlu0 %137 }
  0xb6   :  { %v140_v44 = vsel %vm139_vm6, %v138_v43, %v135_v42 }
  0xb7   :  { %v145_v45 = vsel %vm144_vm7, %v143_v41, %v140_v44 }
  0xb8   :  { %146 = vst [vmem:[%s236_s8] sm:$0xff] %v145_v45 }

</bundles_post_ra>
